<compile_context>
chip_gen: v6e
topology: v6e:2x2x1
jax: 0.10.0
libtpu: 0.0.40
codegen_flags: <defaults>
</compile_context>

<pallas_src>
import functools

import jax
import jax.numpy as jnp
from jax.experimental import pallas as pl
from jax.experimental.pallas import tpu as pltpu

_MiB = 1024 * 1024
# Weight footprints up to this use the resident fast path; even double-buffered by the
# pipeliner (2x) this stays comfortably inside the ~48 MiB per-TensorCore budget (v7x).
_W_RESIDENT_MAX_BYTES = 12 * _MiB
_VMEM_CAP_BYTES = 48 * _MiB


def _round_up(x: int, m: int) -> int:
    return ((x + m - 1) // m) * m


def _choose_tm(M: int, tm_default: int) -> int:
    """M tile: multiple of 16 (bf16 sublane packing), and keep the M grid extent >= 2
    when there are enough rows so v7x megacore sharding has work for both cores."""
    tm = min(tm_default, _round_up(M, 16))
    if M > 256 and _round_up(M, tm) // tm < 2:
        tm = _round_up((M + 1) // 2, 16)
    return max(tm, 8)


# ---------------------------------------------------------------------------
# Kernels
# ---------------------------------------------------------------------------

def _linear_relu_resident_kernel(x_ref, w_ref, b_ref, o_ref):
    """Weight-resident path: whole (K, N) weight + bias live in VMEM, 1-D grid over M.

    x_ref: (tm, K) f32 | w_ref: (K, N) bf16 | b_ref: (1, N) f32 | o_ref: (tm, N).
    """
    x = x_ref[...].astype(w_ref.dtype)                      # in-kernel cast (VPU)
    acc = jnp.dot(x, w_ref[...], preferred_element_type=jnp.float32)
    o_ref[...] = jnp.maximum(acc + b_ref[...], 0.0).astype(o_ref.dtype)


def _linear_relu_reduce_kernel(x_ref, w_ref, b_ref, o_ref, *scratch):
    """General tiled path with a K reduction axis (last grid axis, "arbitrary").

    When the output dtype is f32 the accumulator *is* o_ref (its block index is
    constant along k, so it stays VMEM-resident); otherwise a f32 scratch is used.
    """
    acc_ref = scratch[0] if scratch else o_ref
    k = pl.program_id(2)

    @pl.when(k == 0)
    def _():
        acc_ref[...] = jnp.zeros_like(acc_ref)

    acc_ref[...] += jnp.dot(x_ref[...].astype(w_ref.dtype), w_ref[...],
                            preferred_element_type=jnp.float32)

    @pl.when(k == pl.num_programs(2) - 1)
    def _():
        o_ref[...] = jnp.maximum(acc_ref[...] + b_ref[...], 0.0).astype(o_ref.dtype)


# ---------------------------------------------------------------------------
# Wrapper
# ---------------------------------------------------------------------------

def prepare_linear_block_params(weight, bias, dtype=jnp.bfloat16):
    """Hoist the (out,in)->(in,out) transpose and dtype cast out of the hot path.

    weight: (out_features, in_features) PyTorch layout; bias: (out_features,).
    dtype=jnp.bfloat16 is a deliberate precision tradeoff (MXU bf16 inputs, f32
    accumulation); pass jnp.float32 for exact parity with the PyTorch module.
    """
    w_t = jnp.asarray(weight).T.astype(dtype)    # (K, N)
    b = jnp.asarray(bias, jnp.float32)           # (N,)
    return w_t, b


@functools.partial(jax.jit,
                   static_argnames=("tm", "tn", "tk", "out_dtype", "allow_resident"))
def linear_block(x, w_t, bias, *, tm=512, tn=512, tk=512,
                 out_dtype=jnp.float32, allow_resident=True):
    """y = relu(x @ w_t + bias).

    x: (..., K) f32 (cast to w_t.dtype inside the kernel); w_t: (K, N) pre-transposed
    weight (typically bf16 via prepare_linear_block_params); bias: (N,) f32.
    """
    orig_shape = x.shape
    K = orig_shape[-1]
    x2 = x.reshape(-1, K)
    M = x2.shape[0]
    K2, N = w_t.shape
    assert K == K2
    assert bias.shape == (N,)

    wbytes = jnp.dtype(w_t.dtype).itemsize
    xbytes = jnp.dtype(x2.dtype).itemsize
    obytes = jnp.dtype(out_dtype).itemsize
    b_p = bias.astype(jnp.float32).reshape(1, N)

    use_resident = allow_resident and (K * N * wbytes <= _W_RESIDENT_MAX_BYTES)

    if use_resident:
        # ------------------------- weight-resident fast path -------------------------
        tm_r = _choose_tm(M, tm)

        def _est(t):
            return (2 * K * N * wbytes        # resident weight (budget double buffer)
                    + 2 * t * K * xbytes      # x tiles (double buffered)
                    + 2 * t * N * obytes      # output tiles (double buffered)
                    + 2 * N * 4)              # bias

        while _est(tm_r) > _VMEM_CAP_BYTES - 4 * _MiB and tm_r > 64:
            tm_r = max(64, _round_up(tm_r // 2, 16))

        M_pad = _round_up(M, tm_r)
        x_p = x2 if M_pad == M else jnp.pad(x2, ((0, M_pad - M), (0, 0)))
        grid = (M_pad // tm_r,)

        cost = pl.CostEstimate(
            flops=2 * M_pad * N * K,
            transcendentals=0,
            bytes_accessed=(M_pad * K * xbytes + K * N * wbytes
                            + N * 4 + M_pad * N * obytes))

        # TODO(synk): if DMA stays exposed for tiny-K layers, bump x/out specs to
        # pipeline_mode=pl.Buffered(3) after tile-size/residency tuning.
        out = pl.pallas_call(
            _linear_relu_resident_kernel,
            out_shape=jax.ShapeDtypeStruct((M_pad, N), out_dtype),
            grid_spec=pltpu.PrefetchScalarGridSpec(
                num_scalar_prefetch=0,
                grid=grid,
                in_specs=[
                    pl.BlockSpec((tm_r, K), lambda i: (i, 0)),   # x row tile
                    pl.BlockSpec((K, N), lambda i: (0, 0)),      # resident weight
                    pl.BlockSpec((1, N), lambda i: (0, 0)),      # resident bias
                ],
                out_specs=pl.BlockSpec((tm_r, N), lambda i: (i, 0)),
            ),
            compiler_params=pltpu.CompilerParams(
                dimension_semantics=("parallel",),
                vmem_limit_bytes=int(min(_VMEM_CAP_BYTES,
                                         max(16 * _MiB, _est(tm_r) + 4 * _MiB))),
            ),
            cost_estimate=cost,
        )(x_p, w_t, b_p)
        out = out[:M]
        return out.reshape(orig_shape[:-1] + (N,))

    # ------------------------------ general tiled path ------------------------------
    tm_g = _choose_tm(M, tm)
    tn_g = N if N <= tn else tn          # 512 default: multiple of 256 (v6e/v7x MXU)
    tk_g = K if K <= tk else tk

    M_pad = _round_up(M, tm_g)
    N_pad = _round_up(N, tn_g)
    K_pad = _round_up(K, tk_g)

    x_p = x2
    if (M_pad, K_pad) != (M, K):
        x_p = jnp.pad(x_p, ((0, M_pad - M), (0, K_pad - K)))
    w_p = w_t
    if (K_pad, N_pad) != (K, N):
        w_p = jnp.pad(w_p, ((0, K_pad - K), (0, N_pad - N)))
    if N_pad != N:
        b_p = jnp.pad(b_p, ((0, 0), (0, N_pad - N)))

    grid = (M_pad // tm_g, N_pad // tn_g, K_pad // tk_g)

    use_scratch = jnp.dtype(out_dtype) != jnp.dtype(jnp.float32)
    scratch_shapes = [pltpu.VMEM((tm_g, tn_g), jnp.float32)] if use_scratch else []

    est = (2 * (tm_g * tk_g * xbytes + tk_g * tn_g * wbytes + tn_g * 4)
           + 2 * tm_g * tn_g * obytes
           + (tm_g * tn_g * 4 if use_scratch else 0))

    cost = pl.CostEstimate(
        flops=2 * M_pad * N_pad * K_pad,
        transcendentals=0,
        bytes_accessed=((N_pad // tn_g) * M_pad * K_pad * xbytes      # x re-streamed per N tile
                        + (M_pad // tm_g) * K_pad * N_pad * wbytes    # w re-streamed per M tile
                        + (M_pad // tm_g) * N_pad * 4                 # bias
                        + M_pad * N_pad * obytes))                    # output writeback

    out = pl.pallas_call(
        _linear_relu_reduce_kernel,
        out_shape=jax.ShapeDtypeStruct((M_pad, N_pad), out_dtype),
        grid_spec=pltpu.PrefetchScalarGridSpec(
            num_scalar_prefetch=0,
            grid=grid,
            in_specs=[
                pl.BlockSpec((tm_g, tk_g), lambda i, j, k: (i, k)),   # x tile
                pl.BlockSpec((tk_g, tn_g), lambda i, j, k: (k, j)),   # weight tile
                pl.BlockSpec((1, tn_g), lambda i, j, k: (0, j)),      # bias tile
            ],
            out_specs=pl.BlockSpec((tm_g, tn_g), lambda i, j, k: (i, j)),
            scratch_shapes=scratch_shapes,
        ),
        compiler_params=pltpu.CompilerParams(
            dimension_semantics=("parallel", "parallel", "arbitrary"),
            vmem_limit_bytes=int(min(_VMEM_CAP_BYTES, max(16 * _MiB, 2 * est))),
        ),
        cost_estimate=cost,
    )(x_p, w_p, b_p)

    out = out[:M, :N]
    return out.reshape(orig_shape[:-1] + (N,))


def init_linear_block_params(key, in_features, out_features):
    """Matches LinearBlock.__init__:
    - weight: kaiming_normal_(a=0, nonlinearity='relu', mode='fan_in') => N(0, sqrt(2/fan_in))
    - bias:   PyTorch nn.Linear default: U(-1/sqrt(fan_in), 1/sqrt(fan_in))
    """
    kw, kb = jax.random.split(key)
    std = (2.0 / in_features) ** 0.5
    weight = std * jax.random.normal(kw, (out_features, in_features), jnp.float32)
    bound = 1.0 / (in_features ** 0.5)
    bias = jax.random.uniform(kb, (out_features,), jnp.float32, -bound, bound)
    return weight, bias


if __name__ == "__main__":
    key = jax.random.PRNGKey(0)
    k_x, k_p, k_x2, k_p2 = jax.random.split(key, 4)

    # ---- Small INR-sized case (weight-resident fast path) ----
    batch, in_features, out_features = 16, 32, 64
    x = jax.random.normal(k_x, (batch, in_features), jnp.float32)
    weight, bias = init_linear_block_params(k_p, in_features, out_features)
    w_t, b = prepare_linear_block_params(weight, bias)   # transpose+bf16 hoisted once

    out = linear_block(x, w_t, b)
    out = jax.block_until_ready(out)

    x_bf = x.astype(jnp.bfloat16).astype(jnp.float32)
    w_bf = w_t.astype(jnp.float32)
    ref = jnp.maximum(x_bf @ w_bf + bias, 0.0)

    assert out.shape == (batch, out_features)
    assert out.dtype == jnp.float32
    assert jnp.allclose(out, ref, atol=1e-4, rtol=1e-4)

    ref_f32 = jnp.maximum(x @ weight.T + bias, 0.0)       # loose tol: bf16 MXU inputs
    assert jnp.allclose(out, ref_f32, atol=3e-2, rtol=3e-2)

    # Optional bf16 output (f32 accumulation, cast only at the final store).
    out_bf = linear_block(x, w_t, b, out_dtype=jnp.bfloat16)
    out_bf = jax.block_until_ready(out_bf)
    assert out_bf.dtype == jnp.bfloat16
    assert jnp.allclose(out_bf.astype(jnp.float32), ref, atol=5e-2, rtol=3e-2)

    # ---- Exercise the general tiled K-reduction path (forced, modest shapes) ----
    M2, K2, N2 = 256, 640, 512
    x_big = jax.random.normal(k_x2, (M2, K2), jnp.float32)
    weight2, bias2 = init_linear_block_params(k_p2, K2, N2)
    w_t2, b2 = prepare_linear_block_params(weight2, bias2)

    out2 = linear_block(x_big, w_t2, b2, tm=128, tn=256, tk=256, allow_resident=False)
    out2 = jax.block_until_ready(out2)

    xb2 = x_big.astype(jnp.bfloat16).astype(jnp.float32)
    wb2 = w_t2.astype(jnp.float32)
    ref2 = jnp.maximum(jnp.dot(xb2, wb2, preferred_element_type=jnp.float32) + bias2, 0.0)
    assert out2.shape == (M2, N2)
    assert jnp.allclose(out2, ref2, atol=2e-3, rtol=2e-3)

    print("KERNEL_OK")
</pallas_src>

<mosaic_0001>
module attributes {stable_mosaic.version = 11 : i64} {
  func.func @_linear_relu_resident_kernel(%arg0: i32, %arg1: memref<16x32xf32, #tpu.memory_space<vmem>>, %arg2: memref<32x64xbf16, #tpu.memory_space<vmem>>, %arg3: memref<1x64xf32, #tpu.memory_space<vmem>>, %arg4: memref<16x64xf32, #tpu.memory_space<vmem>>) attributes {dimension_semantics = [#tpu.dimension_semantics<parallel>], iteration_bounds = array<i64: 1>, scalar_prefetch = 0 : i64, scratch_operands = 0 : i64, tpu.core_type = #tpu.core_type<tc>, window_params = [{transform_indices = @transform_0, window_bounds = array<i64: 16, 32>}, {pipeline_mode = #tpu.pipeline_mode<synchronous>, transform_indices = @transform_1, window_bounds = array<i64: 32, 64>}, {pipeline_mode = #tpu.pipeline_mode<synchronous>, transform_indices = @transform_2, window_bounds = array<i64: 1, 64>}, {transform_indices = @transform_3, window_bounds = array<i64: 16, 64>}]} {
    %c0 = arith.constant 0 : index
    %c0_0 = arith.constant 0 : index
    %0 = vector.load %arg1[%c0, %c0_0] : memref<16x32xf32, #tpu.memory_space<vmem>>, vector<16x32xf32>
    %1 = arith.truncf %0 : vector<16x32xf32> to vector<16x32xbf16>
    %c0_1 = arith.constant 0 : index
    %c0_2 = arith.constant 0 : index
    %2 = vector.load %arg2[%c0_1, %c0_2] : memref<32x64xbf16, #tpu.memory_space<vmem>>, vector<32x64xbf16>
    %cst = arith.constant dense<0.000000e+00> : vector<16x64xf32>
    %3 = tpu.matmul %1, %2, %cst {dimension_numbers = #tpu.dot_dimension_numbers<[1], [0], [0], [1], [0, 0, 1, 1], [], []>} : vector<16x32xbf16>, vector<32x64xbf16>, vector<16x64xf32> -> vector<16x64xf32>
    %c0_3 = arith.constant 0 : index
    %c0_4 = arith.constant 0 : index
    %4 = vector.load %arg3[%c0_3, %c0_4] : memref<1x64xf32, #tpu.memory_space<vmem>>, vector<1x64xf32>
    %5 = vector.broadcast %4 : vector<1x64xf32> to vector<16x64xf32>
    %6 = arith.addf %3, %5 : vector<16x64xf32>
    %cst_5 = arith.constant 0.000000e+00 : f32
    %7 = vector.broadcast %cst_5 : f32 to vector<16x64xf32>
    %8 = arith.maximumf %6, %7 : vector<16x64xf32>
    %c0_6 = arith.constant 0 : index
    %c0_7 = arith.constant 0 : index
    %9 = vector.load %arg4[%c0_6, %c0_7] : memref<16x64xf32, #tpu.memory_space<vmem>>, vector<16x64xf32>
    tpu.vector_store %arg4[%c0_6, %c0_7], %8 {strides = array<i32>} : memref<16x64xf32, #tpu.memory_space<vmem>>, vector<16x64xf32>,
    return
  }
  func.func @transform_0(%arg0: i32) -> (i32, i32) {
    %c0_i32 = arith.constant 0 : i32
    %c0_i32_0 = arith.constant 0 : i32
    return %arg0, %c0_i32 : i32, i32
  }
  func.func @transform_1(%arg0: i32) -> (i32, i32) {
    %c0_i32 = arith.constant 0 : i32
    %c0_i32_0 = arith.constant 0 : i32
    %c0_i32_1 = arith.constant 0 : i32
    return %c0_i32, %c0_i32_0 : i32, i32
  }
  func.func @transform_2(%arg0: i32) -> (i32, i32) {
    %c0_i32 = arith.constant 0 : i32
    %c0_i32_0 = arith.constant 0 : i32
    %c0_i32_1 = arith.constant 0 : i32
    return %c0_i32, %c0_i32_0 : i32, i32
  }
  func.func @transform_3(%arg0: i32) -> (i32, i32) {
    %c0_i32 = arith.constant 0 : i32
    %c0_i32_0 = arith.constant 0 : i32
    return %arg0, %c0_i32 : i32, i32
  }
}

</mosaic_0001>

<bundles_post_ra>
// kernel: linear_block.1
= control target key start
LH: loop header
LB: loop body
LE: loop exit
PB: predicated region body
PF: predicated region fallthrough
CT: control target
= control target key end

     0   :  { %8 = vsyncpa [#allocation3], 0  ;;  %s277_s0 = inlined_call_operand.hbm [shape: f32[16,32], index: 0, kind: input, shape index: {}]   ;;  %s278_s1 = inlined_call_operand.hbm [shape: bf16[32,64], index: 1, kind: input, shape index: {}]   ;;  %s279_s2 = inlined_call_operand.vmem [shape: f32[1,64], index: 2, kind: input, shape index: {}]   ;;  %s280_s3 = inlined_call_operand.hbm [shape: f32[16,64], index: 3, kind: output, shape index: {}]  }
   0x1   :  { %9 = vsyncpa [#allocation6], 0 }
   0x2   :  { %10 = vsyncpa [#allocation4], 0  ;;  %s230_s12 = smov [#allocation2]  }
   0x3   :  { %s16_s13 = sshll.u32 %s230_s12, 4  ;;  %s17_s13 = int_to_ptr.vmem [resolvable:$true] %s16_s13 }
   0x4   :  { %s172_s14 = scalar_lea.vmem %s17_s13, 256  ;;  %p177_p1 = scmp.lt.s32.totalorder %s17_s13, %s17_s13 }
   0x5   :  { %p173_p0 = scmp.ne.s32.totalorder %s17_s13, %s172_s14  ;;  %p178_p2 = scmp.lt.s32.totalorder %s172_s14, %s172_s14 }
   0x7   :  { %p179_p3 = por %p178_p2, %p177_p1 }
   0x9   :  { %p180_p4 = pnand %p179_p3, %p173_p0 }
   0xb   :  { %183 = shalt.err (!%p180_p4)
}
   0xc   :  { %s231_s15 = smov 128   ;;  %s232_s16 = smov 8  }
   0xd   :  { %22 = dma.hbm_to_vmem [thread:$0]  %s277_s0, 256, %s17_s13, [#allocation3], %s231_s15, %s231_s15, %s232_s16  }
   0xe   :  { %s233_s19 = smov [#allocation5]  }
   0xf   :  { %s28_s20 = sshll.u32 %s233_s19, 4  ;;  %s29_s20 = int_to_ptr.vmem [resolvable:$true] %s28_s20 }
  0x10   :  { %s192_s21 = scalar_lea.vmem %s29_s20, 256  ;;  %p197_p6 = scmp.lt.s32.totalorder %s29_s20, %s29_s20 }
  0x11   :  { %p193_p5 = scmp.ne.s32.totalorder %s29_s20, %s192_s21  ;;  %p198_p7 = scmp.lt.s32.totalorder %s192_s21, %s192_s21 }
  0x13   :  { %p199_p8 = por %p198_p7, %p197_p6 }
  0x15   :  { %p200_p9 = pnand %p199_p8, %p193_p5 }
  0x17   :  { %203 = shalt.err (!%p200_p9)
}
  0x18   :  { %s234_s22 = smov 64   ;;  %s235_s23 = smov 4  }
  0x19   :  { %34 = dma.hbm_to_vmem [thread:$0]  %s278_s1, 256, %s29_s20, [#allocation6], %s234_s22, %s234_s22, %s235_s23  }
  0x1a   :  { %224 = dma.done.wait [#allocation3], 256  }
  0x1b   :  { %225 = vsyncadd [#allocation3], 4294967040 }
  0x1c   :  { %226 = dma.done.wait [#allocation6], 256  }
  0x1d   :  { %227 = vsyncadd [#allocation6], 4294967040  ;;  %v236_v0 = vmov 0.0   ;;  %vm237_vm0 = vmmov 0   ;;  %v162_v1 = vld [vmem:[#allocation5 + $0x8] sm:$0xff]   ;;  %v163_v2 = vld [vmem:[#allocation5] sm:$0xff]  }
  0x1e   :  { %145 = vmatprep.subr.bf16.mxu0 %v236_v0  ;;  %149 = vmatprep.mubr.msk.bf16.mxu0 %vm237_vm0, %v236_v0  ;;  %v44_v3 = vld [vmem:[#allocation2] sm:$0xff]  ;;  %v45_v4 = vld [vmem:[#allocation2 + $0x8] sm:$0xff]  ;;  %vm70_vm1 = vcmask 261120   ;;  %vm117_vm2 = vcmask 523264   ;;  %s238_s26 = smov [#allocation7]  }
  0x1f   :  { %146 = vmatpush3.bf16.msra.mxu0 %v162_v1  ;;  %v46_v5 = vpack.c.bf16 %v45_v4, %v44_v3  ;;  %v138_v6 = vld [vmem:[%s279_s2] ss:$0 sm:$0xff]  ;;  %s125_s27 = sshll.u32 %s238_s26, 4  ;;  %s126_s27 = int_to_ptr.vmem [resolvable:$true] %s125_s27 }
  0x20   :  { %147 = vmatprep.subr.bf16.mxu0 %v236_v0  ;;  %s204_s28 = scalar_lea.vmem %s126_s27, 256  ;;  %p209_p11 = scmp.lt.s32.totalorder %s126_s27, %s126_s27 }
  0x21   :  { %p205_p10 = scmp.ne.s32.totalorder %s126_s27, %s204_s28  ;;  %p210_p12 = scmp.lt.s32.totalorder %s204_s28, %s204_s28 }
  0x23   :  { %148 = vmatpush3.bf16.msra.mxu0 %v163_v2  ;;  %p211_p13 = por %p210_p12, %p209_p11 }
  0x25   :  { %p212_p0 = pnand %p211_p13, %p205_p10 }
  0x26   :  { %150 = vmatmul.mubr.msk.bf16.vlgmr.msra.gmra.mxu0 %vm70_vm1, %v46_v5 }
  0xe6   :  { %v108_v7 = vpop.f32.mrf.mxu0 }
  0xe7   :  { %v109_v8 = vadd.f32 %v138_v6, %v108_v7 }
  0xe8   :  { %v151_v9 = vpop.f32.mrf.mxu0 }
  0xe9   :  { %v115_v10 = vmax.f32 %v109_v8, 0.0 }
  0xea   :  { %v111_v11 = vpop.f32.mrf.mxu0 }
  0xeb   :  { %v112_v12 = vadd.f32 %v138_v6, %v111_v11  ;;  %118 = vst.msk [vmem:[#allocation7] sm:$0xff] %vm117_vm2, %v115_v10 }
  0xec   :  { %v152_v13 = vpop.f32.mrf.mxu0 }
  0xed   :  { %v116_v14 = vmax.f32 %v112_v12, 0.0 }
  0xef   :  { %119 = vst.msk [vmem:[#allocation7 + $0x8] sm:$0xff] %vm117_vm2, %v116_v14 }
  0xf0   :  { %215 = shalt.err (!%p212_p0)
}
  0xf1   :  { %131 = dma.vmem_to_hbm [thread:$0]  %s126_s27, 256, %s280_s3, [#allocation4], %s231_s15, %s231_s15, %s232_s16  }
  0xf2   :  { %228 = dma.done.wait [#allocation4], 256  }
  0xf3   :  { %229 = vsyncadd [#allocation4], 4294967040 }
  0xf4   :  { %135 = vsyncpa [#allocation3], 1 }
  0xf5   :  { %136 = vsyncpa [#allocation6], 1 }
  0xf6   :  { %137 = vsyncpa [#allocation4], 1 }

</bundles_post_ra>
